<compile_context>
chip_gen: v5e
topology: v5e:2x2
jax: 0.10.0
libtpu: 0.0.40
codegen_flags: <defaults>
</compile_context>

<pallas_src>
import jax
import jax.numpy as jnp
from jax.experimental import pallas as pl
from jax.experimental.pallas import tpu as pltpu

_EPS = 1e-5  # torch.nn.LayerNorm default eps


# ---------------------------------------------------------------------------
# Tiling / VMEM helpers
# ---------------------------------------------------------------------------
def _default_block_rows():
    """Row-tile default sized to the device's VMEM (v7x: 64 MiB/TC, else 128)."""
    try:
        vmem = pltpu.get_tpu_info().vmem_capacity_bytes
    except Exception:
        vmem = 128 << 20
    return 256 if vmem <= (64 << 20) else 512


def _pick_tile(R, block_rows):
    """Row tile: multiple of 8 sublanes; defaults (256/512) are MXU-aligned."""
    if R >= block_rows:
        return block_rows
    return max(((R + 7) // 8) * 8, 8)


def _vmem_limit(pipelined_tile_bytes, resident_bytes):
    """2x double-buffered tiles + grid-invariant blocks + headroom, clamped."""
    need = 2 * pipelined_tile_bytes + 2 * resident_bytes + (8 << 20)
    return int(min(max(need, 16 << 20), 64 << 20))


# ---------------------------------------------------------------------------
# Pallas kernels
# ---------------------------------------------------------------------------
def _layernorm_tile(x, g, b):
    """LayerNorm over the last (lane) dim of a [tm, D] tile, fp32 stats.

    One-pass statistics: sum and sum-of-squares are independent reductions
    (overlap on the XLUs), var = E[x^2] - mean^2 in fp32.
    """
    xf = x.astype(jnp.float32)
    inv_d = 1.0 / xf.shape[-1]
    s = jnp.sum(xf, axis=-1, keepdims=True)
    sq = jnp.sum(xf * xf, axis=-1, keepdims=True)
    mean = s * inv_d
    var = sq * inv_d - mean * mean                       # biased var (torch)
    y = (xf - mean) * jax.lax.rsqrt(var + _EPS)          # rsqrt -> EUP slot
    return y * g.astype(jnp.float32) + b.astype(jnp.float32)


def _layernorm_kernel(x_ref, g_ref, b_ref, o_ref):
    o_ref[...] = _layernorm_tile(x_ref[...], g_ref[...], b_ref[...]).astype(o_ref.dtype)


def _prenorm_ff_kernel(x_ref, g_ref, b_ref, w1_ref, b1_ref, w2_ref, b2_ref, o_ref):
    """Fused PreNorm(FeedForward): LayerNorm -> x@W1+b1 -> GELU -> @W2+b2.

    Matmul operands are fed in the weight dtype (bf16 in the recommended
    config) with fp32 accumulation on the MXU.
    """
    y = _layernorm_tile(x_ref[...], g_ref[...], b_ref[...])
    h = jnp.dot(y.astype(w1_ref.dtype), w1_ref[...],
                preferred_element_type=jnp.float32)
    h = h + b1_ref[...].astype(jnp.float32)
    # TODO(synk): torch nn.GELU() default is exact erf; tanh approximation used
    # here (known-good Pallas lowering), ~1e-3-level deviation from PyTorch.
    h = jax.nn.gelu(h, approximate=True)
    o = jnp.dot(h.astype(w2_ref.dtype), w2_ref[...],
                preferred_element_type=jnp.float32)
    o = o + b2_ref[...].astype(jnp.float32)
    o_ref[...] = o.astype(o_ref.dtype)


# ---------------------------------------------------------------------------
# pallas_call wrappers
# ---------------------------------------------------------------------------
def layernorm_pallas(x2d, gamma, beta, *, block_rows=None):
    """LayerNorm over the last dim of a [R, D] array; output keeps x's dtype."""
    R, D = x2d.shape
    if block_rows is None:
        block_rows = _default_block_rows()
    tm = _pick_tile(R, block_rows)
    g2 = gamma.reshape(1, D)
    b2 = beta.reshape(1, D)

    ebytes = jnp.dtype(x2d.dtype).itemsize
    vmem = _vmem_limit(2 * tm * D * ebytes,              # x tile + out tile
                       2 * D * jnp.dtype(gamma.dtype).itemsize)

    return pl.pallas_call(
        _layernorm_kernel,
        out_shape=jax.ShapeDtypeStruct((R, D), x2d.dtype),
        grid=(pl.cdiv(R, tm),),
        in_specs=[
            pl.BlockSpec((tm, D), lambda i: (i, 0)),     # x rows (pipelined)
            pl.BlockSpec((1, D), lambda i: (0, 0)),      # gamma (grid-invariant)
            pl.BlockSpec((1, D), lambda i: (0, 0)),      # beta
        ],
        out_specs=pl.BlockSpec((tm, D), lambda i: (i, 0)),
        compiler_params=pltpu.CompilerParams(
            dimension_semantics=("parallel",),
            vmem_limit_bytes=vmem),
    )(x2d, g2, b2)


def pre_norm_feedforward(x, gamma, beta, w1, b1, w2, b2, *, block_rows=None):
    """Fused PreNorm + FeedForward (the common `fn` in voint's Transformer)."""
    shape = x.shape
    D = shape[-1]
    H = w1.shape[1]
    Dout = w2.shape[1]
    if block_rows is None:
        block_rows = _default_block_rows()

    x2 = x.reshape(-1, D)
    R = x2.shape[0]
    tm = _pick_tile(R, block_rows)

    g2 = gamma.reshape(1, D)
    be2 = beta.reshape(1, D)
    b1f = b1.reshape(1, H)
    b2f = b2.reshape(1, Dout)

    ebytes = jnp.dtype(x.dtype).itemsize
    wbytes = jnp.dtype(w1.dtype).itemsize
    tile_bytes = tm * D * ebytes + tm * Dout * ebytes
    resident = (2 * D) * jnp.dtype(gamma.dtype).itemsize \
        + (D * H + H + H * Dout + Dout) * wbytes
    vmem = _vmem_limit(tile_bytes, resident)
    # TODO(synk): for ViT-scale D*H that overflow VMEM (esp. v7x 64 MiB), add an
    # H-tiling "arbitrary" grid axis with an fp32 accumulator instead of holding
    # all of W1/W2 resident.

    out = pl.pallas_call(
        _prenorm_ff_kernel,
        out_shape=jax.ShapeDtypeStruct((R, Dout), x.dtype),
        grid=(pl.cdiv(R, tm),),
        in_specs=[
            pl.BlockSpec((tm, D), lambda i: (i, 0)),      # x rows (pipelined)
            pl.BlockSpec((1, D), lambda i: (0, 0)),       # gamma (grid-invariant)
            pl.BlockSpec((1, D), lambda i: (0, 0)),       # beta
            pl.BlockSpec((D, H), lambda i: (0, 0)),       # W1
            pl.BlockSpec((1, H), lambda i: (0, 0)),       # b1
            pl.BlockSpec((H, Dout), lambda i: (0, 0)),    # W2
            pl.BlockSpec((1, Dout), lambda i: (0, 0)),    # b2
        ],
        out_specs=pl.BlockSpec((tm, Dout), lambda i: (i, 0)),
        compiler_params=pltpu.CompilerParams(
            dimension_semantics=("parallel",),
            vmem_limit_bytes=vmem),
    )(x2, g2, be2, w1, b1f, w2, b2f)
    return out.reshape(shape[:-1] + (Dout,))


def pre_norm_forward(x, gamma, beta, fn, *, block_rows=None):
    """Generic PreNorm: Pallas LayerNorm, then arbitrary fn (JAX callable)."""
    shape = x.shape
    D = shape[-1]
    y = layernorm_pallas(x.reshape(-1, D), gamma, beta, block_rows=block_rows)
    # TODO(synk): an arbitrary nn.Module `fn` cannot be fused into the Pallas
    # kernel (the pallas_call is an opaque boundary, so XLA can't fuse the
    # normalize into fn's first matmul); use pre_norm_feedforward() for the
    # fused MLP case.  y stays in the input dtype so the round trip is bf16.
    return fn(y.reshape(shape))


# ---------------------------------------------------------------------------
if __name__ == "__main__":
    # R = 2*17 = 34 rows -> exercises a multi-step grid with a partial last
    # block (cdiv masking, no host-side pad/slice).  D/H are lane-dense (128).
    B, S, D, H = 2, 17, 128, 256
    key = jax.random.PRNGKey(0)
    kx, kg, kb, k1, k2, k3, k4 = jax.random.split(key, 7)
    dt = jnp.bfloat16
    x = jax.random.normal(kx, (B, S, D), dtype=jnp.float32).astype(dt)
    gamma = (1.0 + 0.1 * jax.random.normal(kg, (D,), jnp.float32)).astype(dt)
    beta = (0.1 * jax.random.normal(kb, (D,), jnp.float32)).astype(dt)
    w1 = (0.2 * jax.random.normal(k1, (D, H), jnp.float32)).astype(dt)
    b1 = (0.1 * jax.random.normal(k2, (H,), jnp.float32)).astype(dt)
    w2 = (0.2 * jax.random.normal(k3, (H, D), jnp.float32)).astype(dt)
    b2 = (0.1 * jax.random.normal(k4, (D,), jnp.float32)).astype(dt)

    # Path 1: fused PreNorm(FeedForward) — one pallas_call, bf16 I/O, fp32 acc.
    # (block_rows small to exercise a multi-step grid at this toy size; the
    # default is generation-aware 256/512 at real sizes.)
    out_fused = jax.block_until_ready(
        pre_norm_feedforward(x, gamma, beta, w1, b1, w2, b2, block_rows=16))

    # Path 2: generic PreNorm (Pallas LayerNorm) + fn applied outside.
    def ff(y):
        h = jnp.dot(y.astype(dt), w1, preferred_element_type=jnp.float32)
        h = jax.nn.gelu(h + b1.astype(jnp.float32), approximate=True)
        o = jnp.dot(h.astype(dt), w2, preferred_element_type=jnp.float32)
        return (o + b2.astype(jnp.float32)).astype(dt)

    out_generic = jax.block_until_ready(
        pre_norm_forward(x, gamma, beta, ff, block_rows=16))

    # Pure-JAX reference mirroring torch: LayerNorm(eps=1e-5) in fp32, then the
    # same bf16/fp32 dtype chain as the kernels.
    xf = x.astype(jnp.float32)
    mu = xf.mean(-1, keepdims=True)
    var = ((xf - mu) ** 2).mean(-1, keepdims=True)
    y_ref = (xf - mu) * jax.lax.rsqrt(var + _EPS) * gamma.astype(jnp.float32) \
        + beta.astype(jnp.float32)
    ref = ff(y_ref).astype(jnp.float32)

    ln_pallas = jax.block_until_ready(
        layernorm_pallas(x.reshape(-1, D), gamma, beta, block_rows=16))

    assert out_fused.shape == (B, S, D) and out_fused.dtype == dt
    assert out_generic.shape == (B, S, D) and out_generic.dtype == dt
    assert ln_pallas.dtype == dt

    err_fused = float(jnp.max(jnp.abs(out_fused.astype(jnp.float32) - ref)))
    err_generic = float(jnp.max(jnp.abs(out_generic.astype(jnp.float32) - ref)))
    err_ln = float(jnp.max(jnp.abs(
        ln_pallas.astype(jnp.float32) - y_ref.reshape(-1, D))))

    # bf16 I/O -> tolerances sized to bf16 resolution of O(1..4) magnitudes.
    assert err_ln < 5e-2, err_ln
    assert err_fused < 5e-2, err_fused
    assert err_generic < 5e-2, err_generic
    print("KERNEL_OK")
</pallas_src>

<mosaic_0001>
module attributes {stable_mosaic.version = 11 : i64} {
  func.func @_prenorm_ff_kernel(%arg0: i32, %arg1: memref<16x128xbf16, #tpu.memory_space<vmem>>, %arg2: memref<1x128xbf16, #tpu.memory_space<vmem>>, %arg3: memref<1x128xbf16, #tpu.memory_space<vmem>>, %arg4: memref<128x256xbf16, #tpu.memory_space<vmem>>, %arg5: memref<1x256xbf16, #tpu.memory_space<vmem>>, %arg6: memref<256x128xbf16, #tpu.memory_space<vmem>>, %arg7: memref<1x128xbf16, #tpu.memory_space<vmem>>, %arg8: memref<16x128xbf16, #tpu.memory_space<vmem>>) attributes {dimension_semantics = [#tpu.dimension_semantics<parallel>], iteration_bounds = array<i64: 3>, scalar_prefetch = 0 : i64, scratch_operands = 0 : i64, tpu.core_type = #tpu.core_type<tc>, window_params = [{transform_indices = @transform_0, window_bounds = array<i64: 16, 128>}, {pipeline_mode = #tpu.pipeline_mode<synchronous>, transform_indices = @transform_1, window_bounds = array<i64: 1, 128>}, {pipeline_mode = #tpu.pipeline_mode<synchronous>, transform_indices = @transform_2, window_bounds = array<i64: 1, 128>}, {pipeline_mode = #tpu.pipeline_mode<synchronous>, transform_indices = @transform_3, window_bounds = array<i64: 128, 256>}, {pipeline_mode = #tpu.pipeline_mode<synchronous>, transform_indices = @transform_4, window_bounds = array<i64: 1, 256>}, {pipeline_mode = #tpu.pipeline_mode<synchronous>, transform_indices = @transform_5, window_bounds = array<i64: 256, 128>}, {pipeline_mode = #tpu.pipeline_mode<synchronous>, transform_indices = @transform_6, window_bounds = array<i64: 1, 128>}, {transform_indices = @transform_7, window_bounds = array<i64: 16, 128>}]} {
    %c0 = arith.constant 0 : index
    %c0_0 = arith.constant 0 : index
    %0 = vector.load %arg1[%c0, %c0_0] : memref<16x128xbf16, #tpu.memory_space<vmem>>, vector<16x128xbf16>
    %c0_1 = arith.constant 0 : index
    %c0_2 = arith.constant 0 : index
    %1 = vector.load %arg2[%c0_1, %c0_2] : memref<1x128xbf16, #tpu.memory_space<vmem>>, vector<1x128xbf16>
    %c0_3 = arith.constant 0 : index
    %c0_4 = arith.constant 0 : index
    %2 = vector.load %arg3[%c0_3, %c0_4] : memref<1x128xbf16, #tpu.memory_space<vmem>>, vector<1x128xbf16>
    %3 = arith.extf %0 : vector<16x128xbf16> to vector<16x128xf32>
    %cst = arith.constant dense<0.000000e+00> : vector<16xf32>
    %4 = vector.multi_reduction <add>, %3, %cst [1] : vector<16x128xf32> to vector<16xf32>
    %5 = vector.shape_cast %4 : vector<16xf32> to vector<16x1xf32>
    %6 = arith.mulf %3, %3 : vector<16x128xf32>
    %cst_5 = arith.constant dense<0.000000e+00> : vector<16xf32>
    %7 = vector.multi_reduction <add>, %6, %cst_5 [1] : vector<16x128xf32> to vector<16xf32>
    %8 = vector.shape_cast %7 : vector<16xf32> to vector<16x1xf32>
    %cst_6 = arith.constant 7.812500e-03 : f32
    %9 = vector.broadcast %cst_6 : f32 to vector<16x1xf32>
    %10 = arith.mulf %5, %9 : vector<16x1xf32>
    %cst_7 = arith.constant 7.812500e-03 : f32
    %11 = vector.broadcast %cst_7 : f32 to vector<16x1xf32>
    %12 = arith.mulf %8, %11 : vector<16x1xf32>
    %13 = arith.mulf %10, %10 : vector<16x1xf32>
    %14 = arith.subf %12, %13 : vector<16x1xf32>
    %15 = vector.broadcast %10 : vector<16x1xf32> to vector<16x128xf32>
    %16 = arith.subf %3, %15 : vector<16x128xf32>
    %cst_8 = arith.constant 9.99999974E-6 : f32
    %17 = vector.broadcast %cst_8 : f32 to vector<16x1xf32>
    %18 = arith.addf %14, %17 : vector<16x1xf32>
    %19 = math.rsqrt %18 : vector<16x1xf32>
    %20 = vector.broadcast %19 : vector<16x1xf32> to vector<16x128xf32>
    %21 = arith.mulf %16, %20 : vector<16x128xf32>
    %22 = arith.extf %1 : vector<1x128xbf16> to vector<1x128xf32>
    %23 = vector.broadcast %22 : vector<1x128xf32> to vector<16x128xf32>
    %24 = arith.mulf %21, %23 : vector<16x128xf32>
    %25 = arith.extf %2 : vector<1x128xbf16> to vector<1x128xf32>
    %26 = vector.broadcast %25 : vector<1x128xf32> to vector<16x128xf32>
    %27 = arith.addf %24, %26 : vector<16x128xf32>
    %28 = arith.truncf %27 : vector<16x128xf32> to vector<16x128xbf16>
    %c0_9 = arith.constant 0 : index
    %c0_10 = arith.constant 0 : index
    %29 = vector.load %arg4[%c0_9, %c0_10] : memref<128x256xbf16, #tpu.memory_space<vmem>>, vector<128x256xbf16>
    %cst_11 = arith.constant dense<0.000000e+00> : vector<16x256xf32>
    %30 = tpu.matmul %28, %29, %cst_11 {dimension_numbers = #tpu.dot_dimension_numbers<[1], [0], [0], [1], [0, 0, 1, 1], [], []>} : vector<16x128xbf16>, vector<128x256xbf16>, vector<16x256xf32> -> vector<16x256xf32>
    %c0_12 = arith.constant 0 : index
    %c0_13 = arith.constant 0 : index
    %31 = vector.load %arg5[%c0_12, %c0_13] : memref<1x256xbf16, #tpu.memory_space<vmem>>, vector<1x256xbf16>
    %32 = arith.extf %31 : vector<1x256xbf16> to vector<1x256xf32>
    %33 = vector.broadcast %32 : vector<1x256xf32> to vector<16x256xf32>
    %34 = arith.addf %30, %33 : vector<16x256xf32>
    %35 = arith.mulf %34, %34 : vector<16x256xf32>
    %36 = arith.mulf %34, %35 : vector<16x256xf32>
    %cst_14 = arith.constant 4.471500e-02 : f32
    %37 = vector.broadcast %cst_14 : f32 to vector<16x256xf32>
    %38 = arith.mulf %37, %36 : vector<16x256xf32>
    %39 = arith.addf %34, %38 : vector<16x256xf32>
    %cst_15 = arith.constant 0.797884583 : f32
    %40 = vector.broadcast %cst_15 : f32 to vector<16x256xf32>
    %41 = arith.mulf %40, %39 : vector<16x256xf32>
    %42 = math.tanh %41 : vector<16x256xf32>
    %cst_16 = arith.constant 1.000000e+00 : f32
    %43 = vector.broadcast %cst_16 : f32 to vector<16x256xf32>
    %44 = arith.addf %43, %42 : vector<16x256xf32>
    %cst_17 = arith.constant 5.000000e-01 : f32
    %45 = vector.broadcast %cst_17 : f32 to vector<16x256xf32>
    %46 = arith.mulf %45, %44 : vector<16x256xf32>
    %47 = arith.mulf %34, %46 : vector<16x256xf32>
    %48 = arith.truncf %47 : vector<16x256xf32> to vector<16x256xbf16>
    %c0_18 = arith.constant 0 : index
    %c0_19 = arith.constant 0 : index
    %49 = vector.load %arg6[%c0_18, %c0_19] : memref<256x128xbf16, #tpu.memory_space<vmem>>, vector<256x128xbf16>
    %cst_20 = arith.constant dense<0.000000e+00> : vector<16x128xf32>
    %50 = tpu.matmul %48, %49, %cst_20 {dimension_numbers = #tpu.dot_dimension_numbers<[1], [0], [0], [1], [0, 0, 1, 1], [], []>} : vector<16x256xbf16>, vector<256x128xbf16>, vector<16x128xf32> -> vector<16x128xf32>
    %c0_21 = arith.constant 0 : index
    %c0_22 = arith.constant 0 : index
    %51 = vector.load %arg7[%c0_21, %c0_22] : memref<1x128xbf16, #tpu.memory_space<vmem>>, vector<1x128xbf16>
    %52 = arith.extf %51 : vector<1x128xbf16> to vector<1x128xf32>
    %53 = vector.broadcast %52 : vector<1x128xf32> to vector<16x128xf32>
    %54 = arith.addf %50, %53 : vector<16x128xf32>
    %55 = arith.truncf %54 : vector<16x128xf32> to vector<16x128xbf16>
    %c0_23 = arith.constant 0 : index
    %c0_24 = arith.constant 0 : index
    %56 = vector.load %arg8[%c0_23, %c0_24] : memref<16x128xbf16, #tpu.memory_space<vmem>>, vector<16x128xbf16>
    tpu.vector_store %arg8[%c0_23, %c0_24], %55 {strides = array<i32>} : memref<16x128xbf16, #tpu.memory_space<vmem>>, vector<16x128xbf16>,
    return
  }
  func.func @transform_0(%arg0: i32) -> (i32, i32) {
    %c0_i32 = arith.constant 0 : i32
    %c0_i32_0 = arith.constant 0 : i32
    return %arg0, %c0_i32 : i32, i32
  }
  func.func @transform_1(%arg0: i32) -> (i32, i32) {
    %c0_i32 = arith.constant 0 : i32
    %c0_i32_0 = arith.constant 0 : i32
    %c0_i32_1 = arith.constant 0 : i32
    return %c0_i32, %c0_i32_0 : i32, i32
  }
  func.func @transform_2(%arg0: i32) -> (i32, i32) {
    %c0_i32 = arith.constant 0 : i32
    %c0_i32_0 = arith.constant 0 : i32
    %c0_i32_1 = arith.constant 0 : i32
    return %c0_i32, %c0_i32_0 : i32, i32
  }
  func.func @transform_3(%arg0: i32) -> (i32, i32) {
    %c0_i32 = arith.constant 0 : i32
    %c0_i32_0 = arith.constant 0 : i32
    %c0_i32_1 = arith.constant 0 : i32
    return %c0_i32, %c0_i32_0 : i32, i32
  }
  func.func @transform_4(%arg0: i32) -> (i32, i32) {
    %c0_i32 = arith.constant 0 : i32
    %c0_i32_0 = arith.constant 0 : i32
    %c0_i32_1 = arith.constant 0 : i32
    return %c0_i32, %c0_i32_0 : i32, i32
  }
  func.func @transform_5(%arg0: i32) -> (i32, i32) {
    %c0_i32 = arith.constant 0 : i32
    %c0_i32_0 = arith.constant 0 : i32
    %c0_i32_1 = arith.constant 0 : i32
    return %c0_i32, %c0_i32_0 : i32, i32
  }
  func.func @transform_6(%arg0: i32) -> (i32, i32) {
    %c0_i32 = arith.constant 0 : i32
    %c0_i32_0 = arith.constant 0 : i32
    %c0_i32_1 = arith.constant 0 : i32
    return %c0_i32, %c0_i32_0 : i32, i32
  }
  func.func @transform_7(%arg0: i32) -> (i32, i32) {
    %c0_i32 = arith.constant 0 : i32
    %c0_i32_0 = arith.constant 0 : i32
    return %arg0, %c0_i32 : i32, i32
  }
}

</mosaic_0001>

<bundles_post_ra>
// kernel: tpu_custom_call.1
= control target key start
LH: loop header
LB: loop body
LE: loop exit
PB: predicated region body
PF: predicated region fallthrough
CT: control target
= control target key end

     0   :  { %s1680_s0 = inlined_call_operand.hbm [shape: bf16[34,128], index: 0, kind: input, shape index: {}]   ;;  %s1681_s1 = inlined_call_operand.hbm [shape: bf16[1,128], index: 1, kind: input, shape index: {}]   ;;  %s1682_s2 = inlined_call_operand.vmem [shape: bf16[1,128], index: 2, kind: input, shape index: {}]   ;;  %s1683_s3 = inlined_call_operand.hbm [shape: bf16[128,256], index: 3, kind: input, shape index: {}]   ;;  %s1684_s4 = inlined_call_operand.vmem [shape: bf16[1,256], index: 4, kind: input, shape index: {}]   ;;  %s1685_s5 = inlined_call_operand.hbm [shape: bf16[256,128], index: 5, kind: input, shape index: {}]   ;;  %s1686_s6 = inlined_call_operand.vmem [shape: bf16[1,128], index: 6, kind: input, shape index: {}]   ;;  %s1687_s7 = inlined_call_operand.hbm [shape: bf16[34,128], index: 7, kind: output, shape index: {}]  }
   0x1   :  { %1691 = sst [smem:[#allocation17_spill]] %s1681_s1 }
   0x2   :  { %1692 = sst [smem:[#allocation18_spill]] %s1683_s3 }
   0x3   :  { %12 = vsyncpa [#allocation3], 0 }
   0x4   :  { %14 = vsyncpa [#allocation3 + $0x1], 0 }
   0x5   :  { %15 = vsyncpa [#allocation6], 0 }
   0x6   :  { %16 = vsyncpa [#allocation9], 0 }
   0x7   :  { %17 = vsyncpa [#allocation4], 0 }
   0x8   :  { %19 = vsyncpa [#allocation4 + $0x1], 0  ;;  %s1440_s24 = smov 0   ;;  %s1442_s25 = smov 0  }
   0x9   :  { %s1444_s26 = smov 0   ;;  %s1446_s27 = smov 0  }
   0xa LB: > { %s1461_s28 = sadd.s32 4294967295, %s1385_s27   ;;  %s882_s29 = sadd.s32 4294967294, %s1385_s27   ;;  %s1385_s27 = sphi %s1446_s27, %s1710_s27   ;;  %s1381_s26 = sphi %s1444_s26, %s1714_s26   ;;  %s1377_s25 = sphi %s1442_s25, %s1713_s25   ;;  %s1373_s24 = sphi %s1440_s24, %s1712_s24  }
   0xb   : > { %s1465_s30 = sadd.s32 1, %s1385_s27   ;;  %s32_s8 = sadd.s32 1, %s1381_s26 }
   0xc   : > { %1693 = sst [smem:[#allocation15_spill]] %s1465_s30  ;;  %s29_s9 = ssub.s32 %s1385_s27, %s1465_s30 }
   0xd   : > { %p39_p0 = scmp.ne.s32.totalorder %s1381_s26, %s1377_s25  ;;  %p30_p1 = scmp.eq.s32.totalorder %s29_s9, 0 }
   0xe   : > { %p40_p2 = scmp.eq.s32.totalorder %s1385_s27, 0  ;;  %p45_p3 = scmp.ne.s32.totalorder %s1377_s25, %s1373_s24 }
   0xf   : > { %p1690_p4 = scmp.eq.s32.totalorder %s1461_s28, 0  ;;  %p195_p7 = scmp.eq.s32.totalorder %s1461_s28, 2 }
  0x10   : > { %s1477_s10 = scalar_select %p30_p1, %s1381_s26, %s32_s8  }
  0x11   : > { %p1479_p5 = por %p40_p2, %p39_p0  ;;  %p1485_p6 = por %p1690_p4, %p45_p3 }
  0x12   : > { %1694 = sst [smem:[#allocation16_spill]] %s1477_s10  ;;  %p201_p8 = scmp.eq.s32.totalorder %s882_s29, 2 }
  0x13   : > { %p883_p9 = scmp.ge.s32.totalorder %s1385_s27, 1  ;;  %p208_p10 = scmp.lt.s32.totalorder %s1385_s27, 4 }
  0x14   : > { %p1492_p11 = por %p195_p7, %p39_p0  ;;  %p1496_p12 = por %p201_p8, %p45_p3 }
  0x15   : > { %p1500_p13 = pnand %p883_p9, %p208_p10  ;;  %s1700_s1 = sld [smem:[#allocation17_spill]] }
  0x16   : > { %s1698_s14 = scalar_select %p1496_p12, 1, 0 }
  0x17   : > { %p1095_p1 = pneg %p1500_p13  ;;  %s1387_s19 = smov [#allocation5]  }
  0x18   : > { %s222_s20 = sshll.u32 %s1387_s19, 4  ;;  %s1701_s3 = sld [smem:[#allocation18_spill]]  ;;  %s223_s20 = int_to_ptr.vmem [resolvable:$true] %s222_s20 }
  0x19   : > { %p1514_p0 = pnand %p1095_p1, %p1690_p4  ;;  %s1388_s8 = smov [#allocation7]  }
  0x1a   : > { %s236_s9 = sshll.u32 %s1388_s8, 4  ;;  %s251_s19 = sshll.u32 %s1685_s5, 4  ;;  %s237_s9 = int_to_ptr.vmem [resolvable:$true] %s236_s9  ;;  %s252_s19 = int_to_ptr.hbm [resolvable:$true] %s251_s19 }
  0x1b   : > { %s220_s18 = sshll.u32 %s1700_s1, 4  ;;  %s1389_s21 = smov 128   ;;  %s221_s18 = int_to_ptr.hbm [resolvable:$true] %s220_s18 }
  0x1c   : > { %1098 = dma.hbm_to_vmem [thread:$0]  (!%p1514_p0), %s221_s18, 16, %s223_s20, [#allocation6]  }
  0x1d   : > { %s1390_s22 = smov 8   ;;  %s1391_s1 = smov [#allocation8]  }
  0x1e   : > { %s234_s23 = sshll.u32 %s1701_s3, 4  ;;  %s253_s3 = sshll.u32 %s1391_s1, 4  ;;  %s235_s23 = int_to_ptr.hbm [resolvable:$true] %s234_s23  ;;  %s254_s3 = int_to_ptr.vmem [resolvable:$true] %s253_s3 }
  0x1f   : > { %1101 = dma.hbm_to_vmem [thread:$0]  (!%p1514_p0), %s235_s23, 2048, %s237_s9, [#allocation6], %s1389_s21, %s1389_s21, %s1390_s22  }
  0x20   : > { %s1392_s10 = smov 64   ;;  %s1393_s30 = smov 4  }
  0x21   : > { %1104 = dma.hbm_to_vmem [thread:$0]  (!%p1514_p0), %s252_s19, 2048, %s254_s3, [#allocation9], %s1392_s10, %s1392_s10, %s1393_s30  }
  0x22   : > { %p887_p2 = scmp.ge.s32.totalorder %s1385_s27, 3 }
  0x24   : > { %266 = sbr.rel (%p887_p2) target bundleno = 77 (0x4d), region = 40 }
  0x29   : > { %269 = sbr.rel (!%p1479_p5) target bundleno = 77 (0x4d), region = 44  ;;  %s270_s18 = sand.u32 (%p1479_p5), 1, %s1381_s26  }
  0x2a   : > { %s889_s20 = sshll.u32 (%p1479_p5), %s1385_s27, 1  ;;  %s888_s8 = sshll.u32 (%p1479_p5), %s270_s18, 3 }
  0x2b   : > { %s276_s23 = ssub.s32 (%p1479_p5), 5, %s889_s20  ;;  %s1535_s3 = scalar_lea.sflag (%p1479_p5), [#allocation3], %s270_s18 }
  0x2c   : > { %p277_p3 = scmp.lt.s32.totalorder (%p1479_p5), %s276_s23, 2  ;;  %s274_s30 = scalar_lea.vmem (%p1479_p5), [#allocation2], %s888_s8 }
  0x2e   : > { %s1716_s23 = smov (!%p277_p3, %s276_s23), 2 }
  0x2f   : > { %s890_s1 = sshll.u32 %s1716_s23, 2 }
  0x30   : > { %s280_s9 = ssub.s32 8, %s890_s1 }
  0x31   : > { %s281_s29 = sshll.u32 %s280_s9, 4 }
  0x32   : > { %282 = vsyncadd %s1535_s3, %s281_s29  ;;  %p1538_p5 = scmp.ne.s32.totalorder %s890_s1, 0  ;;  %s1038_s11 = sshll.u32 %s1385_s27, 3 }
  0x33   : > { %s285_s19 = scalar_lea.hbm %s1680_s0, %s1038_s11  ;;  %s1546_s21 = sshll.u32 %s274_s30, 4  ;;  %s290_s21 = int_to_ptr.vmem [resolvable:$true] %s1546_s21 }
  0x34   : > { %s287_s22 = sshll.u32 %s285_s19, 4  ;;  %s894_s18 = sshll.u32 %s1716_s23, 6  ;;  %s1549_s22 = int_to_ptr.hbm [resolvable:$true] %s287_s22 }
  0x35   : > { %s1261_s20 = sshra.s32 %s1549_s22, 4  ;;  %s1263_s8 = sshrl.u32 %s894_s18, 4  ;;  %s1262_s20 = int_to_ptr.hbm [resolvable:$true] %s1261_s20 }
  0x36   : > { %s1268_s1 = scalar_lea.hbm %s1262_s20, %s1263_s8  ;;  %s1272_s30 = scalar_lea.hbm %s1680_s0, 20 }
  0x37   : > { %p1269_p7 = scmp.ne.s32.totalorder %s1262_s20, %s1268_s1  ;;  %p1273_p10 = scmp.lt.s32.totalorder %s1262_s20, %s1680_s0 }
  0x38   : > { %p1274_p1 = scmp.lt.s32.totalorder %s1272_s30, %s1268_s1 }
  0x39   : > { %p1270_p8 = pnand %p1269_p7, %p1538_p5 }
  0x3a   : > { %p1275_p0 = por %p1274_p1, %p1273_p10 }
  0x3b   : > { %p1271_p9 = pneg %p1270_p8 }
  0x3d   : > { %p1276_p2 = pnand %p1275_p0, %p1271_p9 }
  0x3f   : > { %1279 = shalt.err (!%p1276_p2)
}
  0x40   : > { %s1280_s17 = sshra.s32 %s290_s21, 4  ;;  %s1394_s9 = smov [#allocation2]   ;;  %s1281_s17 = int_to_ptr.vmem [resolvable:$true] %s1280_s17 }
  0x41   : > { %s1287_s19 = scalar_lea.vmem %s1281_s17, %s1263_s8  ;;  %s1291_s29 = scalar_lea.vmem %s1394_s9, 16 }
  0x42   : > { %p1288_p3 = scmp.ne.s32.totalorder %s1281_s17, %s1287_s19  ;;  %p1293_p4 = scmp.lt.s32.totalorder %s1291_s29, %s1287_s19 }
  0x44   : > { %p1289_p7 = pnand %p1288_p3, %p1538_p5 }
  0x46   : > { %p1290_p8 = pneg %p1289_p7 }
  0x48   : > { %p1295_p12 = pnand %p1293_p4, %p1290_p8 }
  0x4a   : > { %1298 = shalt.err (!%p1295_p12)
}
  0x4b   : > { %s1395_s20 = smov 64   ;;  %s1396_s1 = smov 4  }
  0x4c   : > { %295 = dma.hbm_to_vmem [thread:$0]  (%p1538_p5), %s1549_s22, %s894_s18, %s290_s21, %s1535_s3, %s1395_s20, %s1395_s20, %s1396_s1  }
  0x4d PF: > { %301 = sbr.rel (%p1500_p13) target bundleno = 589 (0x24d), region = 48  ;;  %s1578_s8 = sand.u32 (!%p1500_p13), 1, %s1377_s25  }
  0x4e   : > { %s896_s30 = sshll.u32 (!%p1500_p13), %s1578_s8, 3  ;;  %s304_s11 = scalar_lea.sflag (!%p1500_p13), [#allocation3], %s1578_s8 }
  0x4f   : > { %s307_s16 = scalar_lea.vmem (!%p1500_p13), [#allocation2], %s896_s30 }
  0x52   : > { %1356 = dma.done.wait (%p1485_p6), %s304_s11, 128  }
  0x53   : > { %1358 = vsyncadd (%p1485_p6), %s304_s11, 4294967168  ;;  %p1704_p4 = scmp.eq.s32.totalorder %s1461_s28, 0 }
  0x55   : > { %1360 = dma.done.wait (%p1704_p4), [#allocation6], 2064   ;;  %p1705_p12 = pmov %p1704_p4 }
  0x56   : > { %p1706_p13 = pmov %p1704_p4 }
  0x57   : > { %1362 = vsyncadd (%p1705_p12), [#allocation6], 4294965232 }
  0x58   : > { %1364 = dma.done.wait (%p1706_p13), [#allocation9], 2048   ;;  %p1707_p5 = pmov %p1704_p4 }
  0x59   : > { %v1073_v0 = vld [vmem:[%s307_s16] sm:$0xff]   ;;  %v951_v11 = vld [vmem:[#allocation7 + $0x60] sm:$0xf]  ;;  %v1052_v12 = vld [vmem:[#allocation7 + $0x64] sm:$0xf0]  ;;  %s353_s22 = scalar_lea.vmem [#allocation10], %s896_s30 }
  0x5a   : > { %1366 = vsyncadd (%p1707_p5), [#allocation9], 4294965248  ;;  %v1596_v1 = vunpack.c.l.bf16 %v1073_v0  ;;  %v1601_v3 = vunpack.c.h.bf16 %v1073_v0  ;;  %v959_v5 = vld [vmem:[#allocation7 + $0x70] sm:$0xf]  ;;  %v1054_v6 = vld [vmem:[#allocation7 + $0x74] sm:$0xf0]  ;;  %v952_v14 = vor.u32 %v1052_v12, %v951_v11 }
  0x5b   : > { %v1053_v7 = vld [vmem:[#allocation7 + $0x74] sm:$0xf]  ;;  %v960_v8 = vor.u32 %v1054_v6, %v959_v5  ;;  %v961_v9 = vld [vmem:[#allocation7 + $0x78] sm:$0xf0]  ;;  %v1051_v13 = vld [vmem:[#allocation7 + $0x64] sm:$0xf] }
  0x5c   : > { %370 = vadd.xlane.f32.xlu0 %v1596_v1  ;;  %v374_v2 = vmul.f32 %v1596_v1, %v1596_v1  ;;  %v375_v4 = vmul.f32 %v1601_v3, %v1601_v3  ;;  %v964_v10 = vor.u32 %v1053_v7, %v961_v9  ;;  %v953_v15 = vld [vmem:[#allocation7 + $0x68] sm:$0xf0]  ;;  %v943_v17 = vld [vmem:[#allocation7 + $0x50] sm:$0xf]  ;;  %v1050_v18 = vld [vmem:[#allocation7 + $0x54] sm:$0xf0] }
  0x5d   : > { %528 = vmatpush.bf16.msra.mxu0 %v960_v8  ;;  %v956_v16 = vor.u32 %v1051_v13, %v953_v15  ;;  %v1049_v19 = vld [vmem:[#allocation7 + $0x54] sm:$0xf]  ;;  %v944_v20 = vor.u32 %v1050_v18, %v943_v17  ;;  %v945_v21 = vld [vmem:[#allocation7 + $0x58] sm:$0xf0]  ;;  %v935_v23 = vld [vmem:[#allocation7 + $0x40] sm:$0xf] }
  0x5e   : > { %376 = vadd.xlane.f32.xlu1 %v374_v2  ;;  %542 = vmatpush.bf16.msra.mxu1 %v964_v10  ;;  %v948_v22 = vor.u32 %v1049_v19, %v945_v21  ;;  %v1048_v24 = vld [vmem:[#allocation7 + $0x44] sm:$0xf0]  ;;  %v1047_v25 = vld [vmem:[#allocation7 + $0x44] sm:$0xf]  ;;  %v937_v27 = vld [vmem:[#allocation7 + $0x48] sm:$0xf0] }
  0x5f   : > { %v936_v26 = vor.u32 %v1048_v24, %v935_v23  ;;  %v940_v28 = vor.u32 %v1047_v25, %v937_v27  ;;  %v927_v29 = vld [vmem:[#allocation7 + $0x30] sm:$0xf]  ;;  %v1046_v30 = vld [vmem:[#allocation7 + $0x34] sm:$0xf0]  ;;  %v1045_v31 = vld [vmem:[#allocation7 + $0x34] sm:$0xf] }
  0x60   : > { %v928_v32 = vor.u32 %v1046_v30, %v927_v29  ;;  %v929_v33 = vld [vmem:[#allocation7 + $0x38] sm:$0xf0]  ;;  %v919_v35 = vld [vmem:[#allocation7 + $0x20] sm:$0xf]  ;;  %v1044_v36 = vld [vmem:[#allocation7 + $0x24] sm:$0xf0] }
  0x61   : > { %529 = vmatpush.bf16.msra.mxu0 %v952_v14  ;;  %v932_v34 = vor.u32 %v1045_v31, %v929_v33  ;;  %v1043_v37 = vld [vmem:[#allocation7 + $0x24] sm:$0xf]  ;;  %v920_v38 = vor.u32 %v1044_v36, %v919_v35  ;;  %v921_v39 = vld [vmem:[#allocation7 + $0x28] sm:$0xf0]  ;;  %v911_v42 = vld [vmem:[#allocation7 + $0x10] sm:$0xf] }
  0x62   : > { %543 = vmatpush.bf16.msra.mxu1 %v956_v16  ;;  %v924_v40 = vor.u32 %v1043_v37, %v921_v39  ;;  %v1042_v43 = vld [vmem:[#allocation7 + $0x14] sm:$0xf0]  ;;  %v1041_v44 = vld [vmem:[#allocation7 + $0x14] sm:$0xf]  ;;  %v913_v47 = vld [vmem:[#allocation7 + $0x18] sm:$0xf0] }
  0x63   : > { %v912_v46 = vor.u32 %v1042_v43, %v911_v42  ;;  %v903_v48 = vld [vmem:[#allocation7] sm:$0xf]  ;;  %v916_v50 = vor.u32 %v1041_v44, %v913_v47  ;;  %v1040_v51 = vld [vmem:[#allocation7 + $0x4] sm:$0xf0]  ;;  %v1039_v52 = vld [vmem:[#allocation7 + $0x4] sm:$0xf] }
  0x64   : > { %372 = vadd.xlane.f32.xlu0 %v1601_v3  ;;  %v905_v53 = vld [vmem:[#allocation7 + $0x8] sm:$0xf0]  ;;  %v904_v56 = vor.u32 %v1040_v51, %v903_v48  ;;  %v366_v13 = vld [vmem:[#allocation5] sm:$0x1]  ;;  %v1061_v35 = vld [vmem:[#allocation8 + $0x30] sm:$0xff]  ;;  %s758_s18 = scalar_lea.sflag [#allocation4], %s1578_s8 }
  0x65   : > { %530 = vmatpush.bf16.msra.mxu0 %v944_v20  ;;  %v908_v58 = vor.u32 %v1039_v52, %v905_v53  ;;  %v414_v15 = vunpack.c.l.bf16 %v366_v13  ;;  %v367_v17 = vld [vmem:[%s1682_s2] sm:$0x1]  ;;  %v1069_v36 = vld [vmem:[#allocation8 + $0x70] sm:$0xff]  ;;  %v1067_v39 = vld [vmem:[#allocation8 + $0x60] sm:$0xff]  ;;  %s1030_s17 = sshll.u32 (%p1492_p11), %s1461_s28, 1 }
  0x66   : > { %378 = vadd.xlane.f32.xlu1 %v375_v4  ;;  %544 = vmatpush.bf16.msra.mxu1 %v948_v22  ;;  %v418_v23 = vunpack.c.l.bf16 %v367_v17  ;;  %v1068_v37 = vld [vmem:[#allocation8 + $0x68] sm:$0xff]  ;;  %v1057_v44 = vld [vmem:[#allocation8 + $0x10] sm:$0xff]  ;;  %v1055_v52 = vld [vmem:[#allocation8] sm:$0xff]  ;;  %s766_s19 = ssub.s32 (%p1492_p11), 5, %s1030_s17 }
  0x67   : > { %v415_v22 = vperm.slane %v414_v15, 0  ;;  %v439_v42 = vld [vmem:[%s1684_s4] sm:$0x3]  ;;  %v1063_v53 = vld [vmem:[#allocation8 + $0x40] sm:$0xff]  ;;  %p767_p6 = scmp.lt.s32.totalorder (%p1492_p11), %s766_s19, 2 }
  0x68   : > { %v419_v29 = vperm.slane %v418_v23, 0  ;;  %v440_v43 = vunpack.c.l.bf16 %v439_v42  ;;  %v1056_v48 = vld [vmem:[#allocation8 + $0x8] sm:$0xff] }
  0x69   : > { %531 = vmatpush.bf16.msra.mxu0 %v936_v26 }
  0x6a   : > { %545 = vmatpush.bf16.msra.mxu1 %v940_v28  ;;  %v443_v47 = vperm.slane %v440_v43, 2 }
  0x6c   : > { %v447_v51 = vperm.slane %v443_v47, 0 }
  0x6d   : > { %532 = vmatpush.bf16.msra.mxu0 %v928_v32 }
  0x6e   : > { %546 = vmatpush.bf16.msra.mxu1 %v932_v34  ;;  %v1070_v34 = vld [vmem:[#allocation8 + $0x78] sm:$0xff] }
  0x6f   : > { %739 = vmatpush.bf16.msra.mxu3 %v1070_v34 }
  0x71   : > { %533 = vmatpush.bf16.msra.mxu0 %v920_v38  ;;  %v1059_v38 = vld [vmem:[#allocation8 + $0x20] sm:$0xff] }
  0x72   : > { %547 = vmatpush.bf16.msra.mxu1 %v924_v40  ;;  %v1058_v40 = vld [vmem:[#allocation8 + $0x18] sm:$0xff] }
  0x73   : > { %740 = vmatpush.bf16.msra.mxu3 %v1069_v36 }
  0x75   : > { %534 = vmatpush.bf16.msra.mxu0 %v912_v46  ;;  %v442_v46 = vperm.slane %v440_v43, 0 }
  0x76   : > { %548 = vmatpush.bf16.msra.mxu1 %v916_v50 }
  0x77   : > { %741 = vmatpush.bf16.msra.mxu3 %v1068_v37  ;;  %v446_v50 = vperm.slane %v442_v46, 0 }
  0x79   : > { %535 = vmatpush.bf16.msra.mxu0 %v904_v56 }
  0x7a   : > { %549 = vmatpush.bf16.msra.mxu1 %v908_v58 }
  0x7b   : > { %742 = vmatpush.bf16.msra.mxu3 %v1067_v39 }
  0xcf   : > { %v371_v41 = vpop.xlane.xlu0 %370 }
  0xd0   : > { %v380_v45 = vmul.f32 0.0078125, %v371_v41  ;;  %v1066_v41 = vld [vmem:[#allocation8 + $0x58] sm:$0xff] }
  0xd1   : > { %v377_v49 = vpop.xlane.xlu1 %376  ;;  %743 = vmatpush.bf16.msra.mxu3 %v1066_v41 }
  0xd2   : > { %v384_v54 = vmul.f32 %v380_v45, %v380_v45  ;;  %v382_v55 = vmul.f32 0.0078125, %v377_v49  ;;  %v388_v19 = vsub.f32 %v1596_v1, %v380_v45  ;;  %v1062_v1 = vld [vmem:[#allocation8 + $0x38] sm:$0xff]  ;;  %v1065_v45 = vld [vmem:[#allocation8 + $0x50] sm:$0xff]  ;;  %v1064_v49 = vld [vmem:[#allocation8 + $0x48] sm:$0xff] }
  0xd3   : > { %725 = vmatpush.bf16.msra.mxu2 %v1062_v1 }
  0xd4   : > { %v386_v57 = vsub.f32 %v382_v55, %v384_v54 }
  0xd5   : > { %744 = vmatpush.bf16.msra.mxu3 %v1065_v45 }
  0xd6   : > { %v390_v59 = vadd.f32 1e-05, %v386_v57 }
  0xd7   : > { %v373_v60 = vpop.xlane.xlu0 %372  ;;  %726 = vmatpush.bf16.msra.mxu2 %v1061_v35 }
  0xd8   : > { %1159 = vrsqrt.f32 %v390_v59  ;;  %v381_v61 = vmul.f32 0.0078125, %v373_v60  ;;  %vm398_vm1 = vweird.f32 %v390_v59 }
  0xd9   : > { %v379_v62 = vpop.xlane.xlu1 %378  ;;  %745 = vmatpush.bf16.msra.mxu3 %v1064_v49 }
  0xda   : > { %v385_v63 = vmul.f32 %v381_v61, %v381_v61  ;;  %v383_v0 = vmul.f32 0.0078125, %v379_v62  ;;  %v389_v25 = vsub.f32 %v1601_v3, %v381_v61  ;;  %v1060_v3 = vld [vmem:[#allocation8 + $0x28] sm:$0xff] }
  0xdb   : > { %727 = vmatpush.bf16.msra.mxu2 %v1060_v3  ;;  %v626_v3 = vld [vmem:[%s1686_s6] sm:$0x1] }
  0xdc   : > { %v387_v2 = vsub.f32 %v383_v0, %v385_v63  ;;  %v627_v37 = vunpack.c.l.bf16 %v626_v3 }
  0xdd   : > { %746 = vmatpush.bf16.msra.mxu3 %v1063_v53 }
  0xde   : > { %v1160_v4 = vpop.eup %1159  ;;  %v391_v5 = vadd.f32 1e-05, %v387_v2 }
  0xdf   : > { %v393_v6 = vmul.f32 %v1160_v4, %v390_v59  ;;  %vm399_vm0 = vweird.f32 %v1160_v4  ;;  %728 = vmatpush.bf16.msra.mxu2 %v1059_v38 }
  0xe0   : > { %1161 = vrsqrt.f32 %v391_v5  ;;  %vm400_vm2 = vmor %vm398_vm1, %vm399_vm0  ;;  %vm408_vm4 = vweird.f32 %v391_v5 }
  0xe1   : > { %v394_v7 = vmul.f32 %v1160_v4, %v393_v6 }
  0xe3   : > { %v395_v8 = vmul.f32 0.5, %v394_v7  ;;  %729 = vmatpush.bf16.msra.mxu2 %v1058_v40  ;;  %v628_v40 = vperm.slane %v627_v37, 0 }
  0xe5   : > { %v396_v9 = vsub.f32 1.5, %v395_v8 }
  0xe6   : > { %v1162_v10 = vpop.eup %1161 }
  0xe7   : > { %v397_v11 = vmul.f32 %v1160_v4, %v396_v9  ;;  %v403_v12 = vmul.f32 %v1162_v10, %v391_v5  ;;  %vm409_vm3 = vweird.f32 %v1162_v10  ;;  %730 = vmatpush.bf16.msra.mxu2 %v1057_v44 }
  0xe8   : > { %vm410_vm5 = vmor %vm408_vm4, %vm409_vm3 }
  0xe9   : > { %v404_v14 = vmul.f32 %v1162_v10, %v403_v12  ;;  %v401_v18 = vsel %vm400_vm2, %v1160_v4, %v397_v11 }
  0xea   : > { %v412_v21 = vmul.f32 %v401_v18, %v388_v19 }
  0xeb   : > { %v405_v16 = vmul.f32 0.5, %v404_v14  ;;  %731 = vmatpush.bf16.msra.mxu2 %v1056_v48 }
  0xec   : > { %v416_v28 = vmul.f32 %v415_v22, %v412_v21 }
  0xed   : > { %v406_v20 = vsub.f32 1.5, %v405_v16 }
  0xee   : > { %v420_v31 = vadd.f32 %v419_v29, %v416_v28 }
  0xef   : > { %v407_v24 = vmul.f32 %v1162_v10, %v406_v20  ;;  %732 = vmatpush.bf16.msra.mxu2 %v1055_v52 }
  0xf1   : > { %v411_v26 = vsel %vm410_vm5, %v1162_v10, %v407_v24 }
  0xf2   : > { %v413_v27 = vmul.f32 %v411_v26, %v389_v25 }
  0xf4   : > { %v417_v30 = vmul.f32 %v415_v22, %v413_v27 }
  0xf6   : > { %v421_v32 = vadd.f32 %v419_v29, %v417_v30 }
  0xf8   : > { %v422_v33 = vpack.c.bf16 %v421_v32, %v420_v31 }
  0xfa   : > { %536 = vmatmul.bf16.vlgmr.msra.gmra.mxu0 %v422_v33  ;;  %550 = vmatmul.bf16.vlgmr.msra.gmra.mxu1 %v422_v33 }
 0x177   : > { %v537_v54 = vpop.f32.mrf.mxu0  ;;  %v551_v55 = vpop.f32.mrf.mxu1 }
 0x178   : > { %v538_v56 = vadd.f32 %v537_v54, %v446_v50  ;;  %v552_v57 = vadd.f32 %v551_v55, %v447_v51 }
 0x17a   : > { %v556_v58 = vmul.f32 %v538_v56, %v538_v56  ;;  %v557_v59 = vmul.f32 %v552_v57, %v552_v57 }
 0x17c   : > { %v560_v60 = vmul.f32 %v556_v58, %v538_v56  ;;  %v561_v61 = vmul.f32 %v557_v59, %v552_v57 }
 0x17e   : > { %v564_v62 = vmul.f32 0.044715, %v560_v60  ;;  %v565_v63 = vmul.f32 0.044715, %v561_v61 }
 0x17f   : > { %v539_v0 = vpop.f32.mrf.mxu0  ;;  %v553_v2 = vpop.f32.mrf.mxu1 }
 0x180   : > { %v568_v4 = vadd.f32 %v564_v62, %v538_v56  ;;  %v569_v5 = vadd.f32 %v565_v63, %v552_v57  ;;  %v540_v6 = vadd.f32 %v539_v0, %v446_v50  ;;  %v554_v7 = vadd.f32 %v553_v2, %v447_v51 }
 0x182   : > { %v558_v8 = vmul.f32 %v540_v6, %v540_v6  ;;  %v559_v9 = vmul.f32 %v554_v7, %v554_v7  ;;  %v572_v10 = vmul.f32 0.7978846, %v568_v4  ;;  %v573_v11 = vmul.f32 0.7978846, %v569_v5 }
 0x184   : > { %v562_v12 = vmul.f32 %v558_v8, %v540_v6  ;;  %v563_v13 = vmul.f32 %v559_v9, %v554_v7  ;;  %1163 = vtanh.f32 %v572_v10 }
 0x185   : > { %1165 = vtanh.f32 %v573_v11 }
 0x186   : > { %v566_v14 = vmul.f32 0.044715, %v562_v12  ;;  %v567_v15 = vmul.f32 0.044715, %v563_v13 }
 0x188   : > { %v570_v16 = vadd.f32 %v566_v14, %v540_v6  ;;  %v571_v17 = vadd.f32 %v567_v15, %v554_v7 }
 0x18a   : > { %v574_v18 = vmul.f32 0.7978846, %v570_v16  ;;  %v575_v19 = vmul.f32 0.7978846, %v571_v17  ;;  %v1164_v20 = vpop.eup %1163 }
 0x18b   : > { %v1166_v21 = vpop.eup %1165  ;;  %v580_v22 = vadd.f32 1.0, %v1164_v20 }
 0x18c   : > { %1167 = vtanh.f32 %v574_v18  ;;  %v581_v23 = vadd.f32 1.0, %v1166_v21 }
 0x18d   : > { %1169 = vtanh.f32 %v575_v19  ;;  %v584_v27 = vmul.f32 0.5, %v580_v22 }
 0x18e   : > { %v585_v29 = vmul.f32 0.5, %v581_v23 }
 0x18f   : > { %v588_v32 = vmul.f32 %v584_v27, %v538_v56 }
 0x190   : > { %v589_v1 = vmul.f32 %v585_v29, %v552_v57 }
 0x192   : > { %v1168_v24 = vpop.eup %1167 }
 0x193   : > { %v1170_v25 = vpop.eup %1169  ;;  %v582_v26 = vadd.f32 1.0, %v1168_v24 }
 0x194   : > { %v583_v28 = vadd.f32 1.0, %v1170_v25 }
 0x195   : > { %v586_v30 = vmul.f32 0.5, %v582_v26 }
 0x196   : > { %v587_v31 = vmul.f32 0.5, %v583_v28 }
 0x197   : > { %v590_v33 = vmul.f32 %v586_v30, %v540_v6 }
 0x198   : > { %v591_v34 = vmul.f32 %v587_v31, %v554_v7 }
 0x199   : > { %v592_v35 = vpack.c.bf16 %v590_v33, %v588_v32 }
 0x19a   : > { %v593_v36 = vpack.c.bf16 %v591_v34, %v589_v1 }
 0x19b   : > { %733 = vmatmul.bf16.vlgmr.msra.gmra.mxu2 %v592_v35 }
 0x19c   : > { %747 = vmatmul.bf16.vlgmr.msra.gmra.mxu3 %v593_v36 }
 0x21e   : > { %v734_v38 = vpop.f32.mrf.mxu2 }
 0x21f   : > { %v748_v39 = vpop.f32.mrf.mxu3  ;;  %v735_v41 = vadd.f32 %v734_v38, %v628_v40 }
 0x221   : > { %v749_v45 = vadd.f32 %v748_v39, %v735_v41 }
 0x226   : > { %v736_v42 = vpop.f32.mrf.mxu2 }
 0x227   : > { %v737_v43 = vadd.f32 %v736_v42, %v628_v40  ;;  %v750_v44 = vpop.f32.mrf.mxu3 }
 0x229   : > { %v751_v46 = vadd.f32 %v750_v44, %v737_v43  ;;  %764 = sbr.rel (!%p1492_p11) target bundleno = 589 (0x24d), region = 68 }
 0x22b   : > { %v1079_v47 = vpack.c.bf16 %v751_v46, %v749_v45 }
 0x22d   : > { %1080 = vst [vmem:[%s353_s22] sm:$0xff] %v1079_v47  }
 0x22e   : > { %s1718_s19 = smov (!%p767_p6, %s766_s19), 2 }
 0x22f   : > { %s1031_s9 = sshll.u32 %s1718_s19, 2 }
 0x230   : > { %s770_s29 = ssub.s32 8, %s1031_s9 }
 0x231   : > { %s771_s20 = sshll.u32 %s770_s29, 4 }
 0x232   : > { %772 = vsyncadd %s758_s18, %s771_s20  ;;  %p1628_p9 = scmp.ne.s32.totalorder %s1031_s9, 0  ;;  %s1071_s13 = sshll.u32 %s1461_s28, 3 }
 0x233   : > { %s775_s16 = scalar_lea.hbm %s1687_s7, %s1071_s13  ;;  %s777_s12 = sshll.u32 %s353_s22, 4  ;;  %s1636_s12 = int_to_ptr.vmem [resolvable:$true] %s777_s12 }
 0x234   : > { %s779_s15 = sshll.u32 %s775_s16, 4  ;;  %s1035_s23 = sshll.u32 %s1718_s19, 6  ;;  %s1638_s15 = int_to_ptr.hbm [resolvable:$true] %s779_s15 }
 0x235   : > { %s1300_s3 = sshra.s32 %s1636_s12, 4  ;;  %s1302_s10 = sshrl.u32 %s1035_s23, 4  ;;  %s1301_s3 = int_to_ptr.vmem [resolvable:$true] %s1300_s3 }
 0x236   : > { %s1307_s21 = scalar_lea.vmem %s1301_s3, %s1302_s10  ;;  %s1397_s28 = smov [#allocation10]  }
 0x237   : > { %p1308_p11 = scmp.ne.s32.totalorder %s1301_s3, %s1307_s21  ;;  %s1311_s17 = scalar_lea.vmem %s1397_s28, 16 }
 0x238   : > { %p1313_p0 = scmp.lt.s32.totalorder %s1311_s17, %s1307_s21 }
 0x239   : > { %p1309_p10 = pnand %p1308_p11, %p1628_p9 }
 0x23b   : > { %p1310_p1 = pneg %p1309_p10 }
 0x23d   : > { %p1315_p2 = pnand %p1313_p0, %p1310_p1 }
 0x23f   : > { %1318 = shalt.err (!%p1315_p2)
}
 0x240   : > { %s1319_s22 = sshra.s32 %s1638_s15, 4  ;;  %s1330_s13 = scalar_lea.hbm %s1687_s7, 20  ;;  %s1320_s22 = int_to_ptr.hbm [resolvable:$true] %s1319_s22 }
 0x241   : > { %s1326_s9 = scalar_lea.hbm %s1320_s22, %s1302_s10  ;;  %p1331_p4 = scmp.lt.s32.totalorder %s1320_s22, %s1687_s7 }
 0x242   : > { %p1327_p3 = scmp.ne.s32.totalorder %s1320_s22, %s1326_s9  ;;  %p1332_p12 = scmp.lt.s32.totalorder %s1330_s13, %s1326_s9 }
 0x244   : > { %p1328_p7 = pnand %p1327_p3, %p1628_p9  ;;  %p1333_p13 = por %p1332_p12, %p1331_p4 }
 0x246   : > { %p1329_p8 = pneg %p1328_p7 }
 0x248   : > { %p1334_p5 = pnand %p1333_p13, %p1329_p8 }
 0x24a   : > { %1337 = shalt.err (!%p1334_p5)
}
 0x24b   : > { %s1398_s16 = smov 64   ;;  %s1399_s3 = smov 4  }
 0x24c   : > { %785 = dma.vmem_to_hbm [thread:$0]  (%p1628_p9), %s1636_s12, %s1035_s23, %s1638_s15, %s758_s18, %s1398_s16, %s1398_s16, %s1399_s3  }
 0x24d PF: > { %p1115_p6 = scmp.ge.s32.totalorder %s1385_s27, 2  ;;  %s794_s10 = sand.u32 1, %s1373_s24  }
 0x24e   : > { %p1709_p11 = scmp.ne.s32.totalorder %s1698_s14, 0  ;;  %s795_s21 = scalar_lea.sflag [#allocation4], %s794_s10 }
 0x250   : > { %p1106_p10 = pnand %p1115_p6, %p1709_p11 }
 0x252   : > { %p1107_p1 = pneg %p1106_p10 }
 0x254   : > { %1368 = dma.done.wait (%p1107_p1), %s795_s21, 128  }
 0x255   : > { %1370 = vsyncadd (%p1107_p1), %s795_s21, 4294967168  ;;  %s1710_s27 = sld [smem:[#allocation15_spill]]  ;;  %s1712_s24 = smov %s1377_s25 }
 0x256   : > { %s1711_s1 = sld [smem:[#allocation16_spill]]  ;;  %s1713_s25 = smov %s1381_s26 }
 0x25b   : > { %p22_p0 = scmp.ge.s32.totalorder %s1710_s27, 5  }
 0x25c   : > { %s1714_s26 = smov %s1711_s1 }
 0x25d   :  { %24 = sbr.rel (!%p22_p0) target bundleno = 10 (0xa), region = 105 }
 0x262   :  { %801 = vsyncpa [#allocation3], 1 }
 0x263   :  { %803 = vsyncpa [#allocation3 + $0x1], 1 }
 0x264   :  { %804 = vsyncpa [#allocation6], 1 }
 0x265   :  { %805 = vsyncpa [#allocation9], 1 }
 0x266   :  { %806 = vsyncpa [#allocation4], 1 }
 0x267   :  { %808 = vsyncpa [#allocation4 + $0x1], 1 }

</bundles_post_ra>
